<compile_context>
chip_gen: v6e
topology: v6e:2x2x1
jax: 0.10.0
libtpu: 0.0.40
codegen_flags: <defaults>
</compile_context>

<pallas_src>
import functools

import jax
import jax.numpy as jnp
from jax.experimental import pallas as pl
from jax.experimental.pallas import tpu as pltpu


def _round_up(x, m):
    return ((x + m - 1) // m) * m


def _make_kernel(*, Cin, L, K, pad, Lout, A, Lpad, tCo):
    """Build the fused conv1d + folded-BN + ReLU kernel (all sizes static)."""

    def kernel(x_ref, w_ref, s_ref, o_ref, *scratch):
        # x_ref : (1, Cin, L)     one batch element
        # w_ref : (K, tCo, Cin)   BN-scale-folded weights, tap-major
        # s_ref : (tCo, 1)        folded BN shift (beta - scale * mean)
        # o_ref : (1, tCo, Lout)
        # scratch (only if pad > 0): (Cin, Lpad) f32 zero-halo staging buffer
        if pad > 0:
            xpad_ref, = scratch
            # Zero the 128-aligned chunks that contain the halos, then land x
            # at the 128-aligned offset A (aligned, unmasked stores; the copy
            # re-fills any x tail touched by the right-chunk zeroing).
            right0 = ((A + L) // 128) * 128
            xpad_ref[:, 0:A] = jnp.zeros((Cin, A), jnp.float32)
            xpad_ref[:, right0:Lpad] = jnp.zeros((Cin, Lpad - right0), jnp.float32)
            xpad_ref[:, A:A + L] = x_ref[0].astype(jnp.float32)

            def tap(k):                      # input window for filter tap k
                s0 = A - pad + k
                return xpad_ref[:, s0:s0 + Lout]
        else:
            def tap(k):                      # padding == 0: slice input directly
                return x_ref[0, :, k:k + Lout]

        # Accumulator starts at the folded BN shift -> no separate bias pass.
        acc = jnp.broadcast_to(s_ref[...].astype(jnp.float32), (tCo, Lout))
        for k in range(K):                   # static unroll over the K taps
            acc = acc + jnp.dot(w_ref[k].astype(jnp.float32),
                                tap(k).astype(jnp.float32),
                                preferred_element_type=jnp.float32)
        o_ref[...] = jnp.maximum(acc, 0.0).astype(o_ref.dtype)[None]

    return kernel


@functools.partial(jax.jit, static_argnames=("padding", "eps"))
def basic_conv1d_bn_relu(x, weight, gamma, beta, running_mean, running_var,
                         *, padding=0, eps=1e-5):
    """BasicConv1d forward: Conv1d(bias=False) -> BatchNorm1d (inference) -> ReLU.

    x: (N, Cin, L) f32, weight: (Cout, Cin, K) (PyTorch layout), BN params: (Cout,).
    """
    # TODO(synk): BatchNorm1d is applied in inference mode (running stats folded
    # into the conv); training-mode batch statistics are not computed in-kernel.
    # TODO(synk): stride > 1 / dilation / groups not implemented (module defaults).
    N, Cin, L = x.shape
    Cout, Cin_w, K = weight.shape
    assert Cin_w == Cin, "weight/input channel mismatch"
    pad = int(padding)
    Lout = L + 2 * pad - K + 1
    assert Lout >= 1

    # Fold inference BN into the conv: y = scale*conv(x) + shift.
    scale = gamma / jnp.sqrt(running_var + eps)                          # (Cout,)
    w_kmajor = jnp.transpose(weight * scale[:, None, None], (2, 0, 1))   # (K,Cout,Cin)
    shift = (beta - scale * running_mean).reshape(Cout, 1).astype(jnp.float32)

    # Output-channel tiling: second parallel grid axis, keeps per-step VMEM
    # small (matters on v7x's 64 MiB VMEM / v5e's 16 MiB default scoped limit).
    if Cout % 8 == 0 and Cout > 64:
        tCo = 64 if Cout % 64 == 0 else 8
    else:
        tCo = Cout
    nCo = Cout // tCo

    # In-kernel halo staging (only needed when padding > 0).
    if pad > 0:
        A = 128                                    # 128-aligned landing offset
        Lpad = _round_up(A + L + pad, 128)         # lane-dense scratch extent
        scratch_shapes = [pltpu.VMEM((Cin, Lpad), jnp.float32)]
    else:
        A, Lpad = 0, 0
        scratch_shapes = []

    kernel = _make_kernel(Cin=Cin, L=L, K=K, pad=pad, Lout=Lout,
                          A=A, Lpad=Lpad, tCo=tCo)

    cost = pl.CostEstimate(
        flops=2 * N * Cout * Cin * K * Lout + 2 * N * Cout * Lout,
        transcendentals=0,
        bytes_accessed=4 * (N * Cin * L + N * Cout * Lout + K * Cout * Cin + Cout),
    )

    return pl.pallas_call(
        kernel,
        out_shape=jax.ShapeDtypeStruct((N, Cout, Lout), x.dtype),
        grid_spec=pltpu.PrefetchScalarGridSpec(
            num_scalar_prefetch=0,
            grid=(N, nCo),
            in_specs=[
                pl.BlockSpec((1, Cin, L), lambda n, j: (n, 0, 0)),
                pl.BlockSpec((K, tCo, Cin), lambda n, j: (0, j, 0)),
                pl.BlockSpec((tCo, 1), lambda n, j: (j, 0)),
            ],
            out_specs=pl.BlockSpec((1, tCo, Lout), lambda n, j: (n, j, 0)),
            scratch_shapes=scratch_shapes,
        ),
        compiler_params=pltpu.CompilerParams(
            dimension_semantics=("parallel", "parallel")),
        cost_estimate=cost,
    )(x, w_kmajor, shift)


def _reference(x, weight, gamma, beta, mean, var, *, padding=0, eps=1e-5):
    """Pure-JAX reference: Conv1d (cross-correlation) + inference BN + ReLU."""
    y = jax.lax.conv_general_dilated(
        x, weight, window_strides=(1,), padding=[(padding, padding)],
        dimension_numbers=("NCH", "OIH", "NCH"))
    y = (y - mean[None, :, None]) * (gamma / jnp.sqrt(var + eps))[None, :, None]
    y = y + beta[None, :, None]
    return jnp.maximum(y, 0.0)


if __name__ == "__main__":
    # Small shapes consistent with the module: Conv1d input is (N, Cin, L).
    # L chosen so the default (padding=0) output length 256 is lane-dense.
    N, Cin, Cout, L, K = 2, 4, 8, 264, 9

    key = jax.random.PRNGKey(0)
    kx, kw, kg, kb, km, kv = jax.random.split(key, 6)

    x = jax.random.normal(kx, (N, Cin, L), dtype=jnp.float32)
    bound = 1.0 / jnp.sqrt(jnp.float32(Cin * K))        # PyTorch Conv1d init bound
    weight = jax.random.uniform(kw, (Cout, Cin, K), jnp.float32, -bound, bound)
    gamma = jax.random.uniform(kg, (Cout,), jnp.float32, 0.5, 1.5)
    beta = 0.1 * jax.random.normal(kb, (Cout,), jnp.float32)
    running_mean = 0.1 * jax.random.normal(km, (Cout,), jnp.float32)
    running_var = jax.random.uniform(kv, (Cout,), jnp.float32, 0.5, 1.5)

    # padding=0 is the nn.Conv1d default; padding=4 exercises the in-kernel halo
    # path (BasicConv1d forwards **kwargs to nn.Conv1d, so padding is valid).
    for pad in (0, 4):
        out = basic_conv1d_bn_relu(x, weight, gamma, beta,
                                   running_mean, running_var, padding=pad)
        out = jax.block_until_ready(out)
        ref = _reference(x, weight, gamma, beta, running_mean, running_var,
                         padding=pad)
        assert out.shape == ref.shape, (out.shape, ref.shape)
        # Both sides run f32 conv/matmul passes on the MXU whose internal pass
        # structure may differ slightly; structural bugs would be O(1) off.
        assert jnp.allclose(out, ref, atol=2e-3, rtol=2e-3), f"mismatch pad={pad}"

    print("KERNEL_OK")
</pallas_src>

<mosaic_0001>
module attributes {stable_mosaic.version = 11 : i64} {
  func.func @kernel(%arg0: i32, %arg1: i32, %arg2: memref<1x4x264xf32, #tpu.memory_space<vmem>>, %arg3: memref<9x8x4xf32, #tpu.memory_space<vmem>>, %arg4: memref<8x1xf32, #tpu.memory_space<vmem>>, %arg5: memref<1x8x256xf32, #tpu.memory_space<vmem>>) attributes {dimension_semantics = [#tpu.dimension_semantics<parallel>, #tpu.dimension_semantics<parallel>], iteration_bounds = array<i64: 2, 1>, scalar_prefetch = 0 : i64, scratch_operands = 0 : i64, tpu.core_type = #tpu.core_type<tc>, window_params = [{transform_indices = @transform_0, window_bounds = array<i64: 1, 4, 264>}, {transform_indices = @transform_1, window_bounds = array<i64: 9, 8, 4>}, {transform_indices = @transform_2, window_bounds = array<i64: 8, 1>}, {transform_indices = @transform_3, window_bounds = array<i64: 1, 8, 256>}]} {
    %c0 = arith.constant 0 : index
    %c0_0 = arith.constant 0 : index
    %0 = vector.load %arg4[%c0, %c0_0] : memref<8x1xf32, #tpu.memory_space<vmem>>, vector<8x1xf32>
    %1 = vector.shape_cast %0 : vector<8x1xf32> to vector<8x1xf32>
    %2 = vector.broadcast %1 : vector<8x1xf32> to vector<8x256xf32>
    %c0_1 = arith.constant 0 : index
    %c0_2 = arith.constant 0 : index
    %c0_3 = arith.constant 0 : index
    %3 = vector.load %arg3[%c0_1, %c0_2, %c0_3] : memref<9x8x4xf32, #tpu.memory_space<vmem>>, vector<1x8x4xf32>
    %4 = vector.shape_cast %3 : vector<1x8x4xf32> to vector<8x4xf32>
    %c0_4 = arith.constant 0 : index
    %c0_5 = arith.constant 0 : index
    %c0_6 = arith.constant 0 : index
    %5 = vector.load %arg2[%c0_4, %c0_5, %c0_6] : memref<1x4x264xf32, #tpu.memory_space<vmem>>, vector<1x4x256xf32>
    %6 = vector.shape_cast %5 : vector<1x4x256xf32> to vector<4x256xf32>
    %cst = arith.constant dense<0.000000e+00> : vector<8x256xf32>
    %7 = tpu.matmul %4, %6, %cst {dimension_numbers = #tpu.dot_dimension_numbers<[1], [0], [0], [1], [0, 0, 1, 1], [], []>} : vector<8x4xf32>, vector<4x256xf32>, vector<8x256xf32> -> vector<8x256xf32>
    %8 = arith.addf %2, %7 : vector<8x256xf32>
    %c1 = arith.constant 1 : index
    %c0_7 = arith.constant 0 : index
    %c0_8 = arith.constant 0 : index
    %9 = vector.load %arg3[%c1, %c0_7, %c0_8] : memref<9x8x4xf32, #tpu.memory_space<vmem>>, vector<1x8x4xf32>
    %10 = vector.shape_cast %9 : vector<1x8x4xf32> to vector<8x4xf32>
    %c0_9 = arith.constant 0 : index
    %c0_10 = arith.constant 0 : index
    %c1_11 = arith.constant 1 : index
    %11 = vector.load %arg2[%c0_9, %c0_10, %c1_11] : memref<1x4x264xf32, #tpu.memory_space<vmem>>, vector<1x4x256xf32>
    %12 = vector.shape_cast %11 : vector<1x4x256xf32> to vector<4x256xf32>
    %cst_12 = arith.constant dense<0.000000e+00> : vector<8x256xf32>
    %13 = tpu.matmul %10, %12, %cst_12 {dimension_numbers = #tpu.dot_dimension_numbers<[1], [0], [0], [1], [0, 0, 1, 1], [], []>} : vector<8x4xf32>, vector<4x256xf32>, vector<8x256xf32> -> vector<8x256xf32>
    %14 = arith.addf %8, %13 : vector<8x256xf32>
    %c2 = arith.constant 2 : index
    %c0_13 = arith.constant 0 : index
    %c0_14 = arith.constant 0 : index
    %15 = vector.load %arg3[%c2, %c0_13, %c0_14] : memref<9x8x4xf32, #tpu.memory_space<vmem>>, vector<1x8x4xf32>
    %16 = vector.shape_cast %15 : vector<1x8x4xf32> to vector<8x4xf32>
    %c0_15 = arith.constant 0 : index
    %c0_16 = arith.constant 0 : index
    %c2_17 = arith.constant 2 : index
    %17 = vector.load %arg2[%c0_15, %c0_16, %c2_17] : memref<1x4x264xf32, #tpu.memory_space<vmem>>, vector<1x4x256xf32>
    %18 = vector.shape_cast %17 : vector<1x4x256xf32> to vector<4x256xf32>
    %cst_18 = arith.constant dense<0.000000e+00> : vector<8x256xf32>
    %19 = tpu.matmul %16, %18, %cst_18 {dimension_numbers = #tpu.dot_dimension_numbers<[1], [0], [0], [1], [0, 0, 1, 1], [], []>} : vector<8x4xf32>, vector<4x256xf32>, vector<8x256xf32> -> vector<8x256xf32>
    %20 = arith.addf %14, %19 : vector<8x256xf32>
    %c3 = arith.constant 3 : index
    %c0_19 = arith.constant 0 : index
    %c0_20 = arith.constant 0 : index
    %21 = vector.load %arg3[%c3, %c0_19, %c0_20] : memref<9x8x4xf32, #tpu.memory_space<vmem>>, vector<1x8x4xf32>
    %22 = vector.shape_cast %21 : vector<1x8x4xf32> to vector<8x4xf32>
    %c0_21 = arith.constant 0 : index
    %c0_22 = arith.constant 0 : index
    %c3_23 = arith.constant 3 : index
    %23 = vector.load %arg2[%c0_21, %c0_22, %c3_23] : memref<1x4x264xf32, #tpu.memory_space<vmem>>, vector<1x4x256xf32>
    %24 = vector.shape_cast %23 : vector<1x4x256xf32> to vector<4x256xf32>
    %cst_24 = arith.constant dense<0.000000e+00> : vector<8x256xf32>
    %25 = tpu.matmul %22, %24, %cst_24 {dimension_numbers = #tpu.dot_dimension_numbers<[1], [0], [0], [1], [0, 0, 1, 1], [], []>} : vector<8x4xf32>, vector<4x256xf32>, vector<8x256xf32> -> vector<8x256xf32>
    %26 = arith.addf %20, %25 : vector<8x256xf32>
    %c4 = arith.constant 4 : index
    %c0_25 = arith.constant 0 : index
    %c0_26 = arith.constant 0 : index
    %27 = vector.load %arg3[%c4, %c0_25, %c0_26] : memref<9x8x4xf32, #tpu.memory_space<vmem>>, vector<1x8x4xf32>
    %28 = vector.shape_cast %27 : vector<1x8x4xf32> to vector<8x4xf32>
    %c0_27 = arith.constant 0 : index
    %c0_28 = arith.constant 0 : index
    %c4_29 = arith.constant 4 : index
    %29 = vector.load %arg2[%c0_27, %c0_28, %c4_29] : memref<1x4x264xf32, #tpu.memory_space<vmem>>, vector<1x4x256xf32>
    %30 = vector.shape_cast %29 : vector<1x4x256xf32> to vector<4x256xf32>
    %cst_30 = arith.constant dense<0.000000e+00> : vector<8x256xf32>
    %31 = tpu.matmul %28, %30, %cst_30 {dimension_numbers = #tpu.dot_dimension_numbers<[1], [0], [0], [1], [0, 0, 1, 1], [], []>} : vector<8x4xf32>, vector<4x256xf32>, vector<8x256xf32> -> vector<8x256xf32>
    %32 = arith.addf %26, %31 : vector<8x256xf32>
    %c5 = arith.constant 5 : index
    %c0_31 = arith.constant 0 : index
    %c0_32 = arith.constant 0 : index
    %33 = vector.load %arg3[%c5, %c0_31, %c0_32] : memref<9x8x4xf32, #tpu.memory_space<vmem>>, vector<1x8x4xf32>
    %34 = vector.shape_cast %33 : vector<1x8x4xf32> to vector<8x4xf32>
    %c0_33 = arith.constant 0 : index
    %c0_34 = arith.constant 0 : index
    %c5_35 = arith.constant 5 : index
    %35 = vector.load %arg2[%c0_33, %c0_34, %c5_35] : memref<1x4x264xf32, #tpu.memory_space<vmem>>, vector<1x4x256xf32>
    %36 = vector.shape_cast %35 : vector<1x4x256xf32> to vector<4x256xf32>
    %cst_36 = arith.constant dense<0.000000e+00> : vector<8x256xf32>
    %37 = tpu.matmul %34, %36, %cst_36 {dimension_numbers = #tpu.dot_dimension_numbers<[1], [0], [0], [1], [0, 0, 1, 1], [], []>} : vector<8x4xf32>, vector<4x256xf32>, vector<8x256xf32> -> vector<8x256xf32>
    %38 = arith.addf %32, %37 : vector<8x256xf32>
    %c6 = arith.constant 6 : index
    %c0_37 = arith.constant 0 : index
    %c0_38 = arith.constant 0 : index
    %39 = vector.load %arg3[%c6, %c0_37, %c0_38] : memref<9x8x4xf32, #tpu.memory_space<vmem>>, vector<1x8x4xf32>
    %40 = vector.shape_cast %39 : vector<1x8x4xf32> to vector<8x4xf32>
    %c0_39 = arith.constant 0 : index
    %c0_40 = arith.constant 0 : index
    %c6_41 = arith.constant 6 : index
    %41 = vector.load %arg2[%c0_39, %c0_40, %c6_41] : memref<1x4x264xf32, #tpu.memory_space<vmem>>, vector<1x4x256xf32>
    %42 = vector.shape_cast %41 : vector<1x4x256xf32> to vector<4x256xf32>
    %cst_42 = arith.constant dense<0.000000e+00> : vector<8x256xf32>
    %43 = tpu.matmul %40, %42, %cst_42 {dimension_numbers = #tpu.dot_dimension_numbers<[1], [0], [0], [1], [0, 0, 1, 1], [], []>} : vector<8x4xf32>, vector<4x256xf32>, vector<8x256xf32> -> vector<8x256xf32>
    %44 = arith.addf %38, %43 : vector<8x256xf32>
    %c7 = arith.constant 7 : index
    %c0_43 = arith.constant 0 : index
    %c0_44 = arith.constant 0 : index
    %45 = vector.load %arg3[%c7, %c0_43, %c0_44] : memref<9x8x4xf32, #tpu.memory_space<vmem>>, vector<1x8x4xf32>
    %46 = vector.shape_cast %45 : vector<1x8x4xf32> to vector<8x4xf32>
    %c0_45 = arith.constant 0 : index
    %c0_46 = arith.constant 0 : index
    %c7_47 = arith.constant 7 : index
    %47 = vector.load %arg2[%c0_45, %c0_46, %c7_47] : memref<1x4x264xf32, #tpu.memory_space<vmem>>, vector<1x4x256xf32>
    %48 = vector.shape_cast %47 : vector<1x4x256xf32> to vector<4x256xf32>
    %cst_48 = arith.constant dense<0.000000e+00> : vector<8x256xf32>
    %49 = tpu.matmul %46, %48, %cst_48 {dimension_numbers = #tpu.dot_dimension_numbers<[1], [0], [0], [1], [0, 0, 1, 1], [], []>} : vector<8x4xf32>, vector<4x256xf32>, vector<8x256xf32> -> vector<8x256xf32>
    %50 = arith.addf %44, %49 : vector<8x256xf32>
    %c8 = arith.constant 8 : index
    %c0_49 = arith.constant 0 : index
    %c0_50 = arith.constant 0 : index
    %51 = vector.load %arg3[%c8, %c0_49, %c0_50] : memref<9x8x4xf32, #tpu.memory_space<vmem>>, vector<1x8x4xf32>
    %52 = vector.shape_cast %51 : vector<1x8x4xf32> to vector<8x4xf32>
    %c0_51 = arith.constant 0 : index
    %c0_52 = arith.constant 0 : index
    %c8_53 = arith.constant 8 : index
    %53 = vector.load %arg2[%c0_51, %c0_52, %c8_53] : memref<1x4x264xf32, #tpu.memory_space<vmem>>, vector<1x4x256xf32>
    %54 = vector.shape_cast %53 : vector<1x4x256xf32> to vector<4x256xf32>
    %cst_54 = arith.constant dense<0.000000e+00> : vector<8x256xf32>
    %55 = tpu.matmul %52, %54, %cst_54 {dimension_numbers = #tpu.dot_dimension_numbers<[1], [0], [0], [1], [0, 0, 1, 1], [], []>} : vector<8x4xf32>, vector<4x256xf32>, vector<8x256xf32> -> vector<8x256xf32>
    %56 = arith.addf %50, %55 : vector<8x256xf32>
    %cst_55 = arith.constant 0.000000e+00 : f32
    %57 = vector.broadcast %cst_55 : f32 to vector<8x256xf32>
    %58 = arith.maximumf %56, %57 : vector<8x256xf32>
    %59 = vector.shape_cast %58 : vector<8x256xf32> to vector<1x8x256xf32>
    %c0_56 = arith.constant 0 : index
    %c0_57 = arith.constant 0 : index
    %c0_58 = arith.constant 0 : index
    %60 = vector.load %arg5[%c0_56, %c0_57, %c0_58] : memref<1x8x256xf32, #tpu.memory_space<vmem>>, vector<1x8x256xf32>
    tpu.vector_store %arg5[%c0_56, %c0_57, %c0_58], %59 {strides = array<i32>} : memref<1x8x256xf32, #tpu.memory_space<vmem>>, vector<1x8x256xf32>,
    return
  }
  func.func @transform_0(%arg0: i32, %arg1: i32) -> (i32, i32, i32) {
    %c0_i32 = arith.constant 0 : i32
    %c0_i32_0 = arith.constant 0 : i32
    %c0_i32_1 = arith.constant 0 : i32
    return %arg0, %c0_i32, %c0_i32_0 : i32, i32, i32
  }
  func.func @transform_1(%arg0: i32, %arg1: i32) -> (i32, i32, i32) {
    %c0_i32 = arith.constant 0 : i32
    %c0_i32_0 = arith.constant 0 : i32
    %c0_i32_1 = arith.constant 0 : i32
    return %c0_i32, %arg1, %c0_i32_0 : i32, i32, i32
  }
  func.func @transform_2(%arg0: i32, %arg1: i32) -> (i32, i32) {
    %c0_i32 = arith.constant 0 : i32
    %c0_i32_0 = arith.constant 0 : i32
    return %arg1, %c0_i32 : i32, i32
  }
  func.func @transform_3(%arg0: i32, %arg1: i32) -> (i32, i32, i32) {
    %c0_i32 = arith.constant 0 : i32
    %c0_i32_0 = arith.constant 0 : i32
    return %arg0, %arg1, %c0_i32 : i32, i32, i32
  }
}

</mosaic_0001>

<bundles_post_ra>
// kernel: basic_conv1d_bn_relu.1
= control target key start
LH: loop header
LB: loop body
LE: loop exit
PB: predicated region body
PF: predicated region fallthrough
CT: control target
= control target key end

     0   :  { %8 = vsyncpa [#allocation3], 0  ;;  %s1601_s0 = inlined_call_operand.vmem [shape: f32[2,4,264], index: 0, kind: input, shape index: {}]   ;;  %s1602_s1 = inlined_call_operand.vmem [shape: f32[9,8,4], index: 1, kind: input, shape index: {}]   ;;  %s1603_s2 = inlined_call_operand.vmem [shape: f32[8,1], index: 2, kind: input, shape index: {}]   ;;  %s1604_s3 = inlined_call_operand.hbm [shape: f32[2,8,256], index: 3, kind: output, shape index: {}]  }
   0x1   :  { %10 = vsyncpa [#allocation3 + $0x1], 0  ;;  %s1425_s12 = smov 0   ;;  %s1427_s13 = smov 0  }
   0x2   :  { %s1429_s14 = smov 0   ;;  %s1431_s15 = smov 0  }
   0x3   :  { %s1433_s16 = smov 0   ;;  %s1435_s17 = smov 0  }
   0x4 LB: > { %s1198_s18 = sadd.s32 4294967295, %s1392_s17   ;;  %s1199_s19 = sadd.s32 4294967294, %s1392_s17   ;;  %s1392_s17 = sphi %s1435_s17, %s16_s17   ;;  %s1388_s16 = sphi %s1433_s16, %s1611_s16   ;;  %s1384_s15 = sphi %s1431_s15, %s1610_s15   ;;  %s1380_s14 = sphi %s1429_s14, %s1609_s14   ;;  %s1376_s13 = sphi %s1427_s13, %s1608_s13   ;;  %s1372_s12 = sphi %s1425_s12, %s1607_s12  }
   0x5   : > { %s28_s20 = sadd.s32 1, %s1388_s16  ;;  %s115_s21 = sadd.s32 1, %s1380_s14 }
   0x6   : > { %p30_p0 = scmp.ge.s32.totalorder %s28_s20, 2  ;;  %p125_p1 = scmp.ne.s32.totalorder %s1380_s14, %s1376_s13 }
   0x7   : > { %p126_p2 = scmp.eq.s32.totalorder %s1198_s18, 1  ;;  %p131_p3 = scmp.ne.s32.totalorder %s1376_s13, %s1372_s12 }
   0x8   : > { %s1613_s20 = smov (%p30_p0, %s28_s20), 0  ;;  %p132_p5 = scmp.eq.s32.totalorder %s1199_s19, 1 }
   0x9   : > { %p1465_p4 = por %p126_p2, %p125_p1  ;;  %s110_s23 = ssub.s32 %s1388_s16, %s1613_s20 }
   0xa   : > { %p1204_p6 = scmp.ge.s32.totalorder %s1392_s17, 1  ;;  %p113_p7 = scmp.eq.s32.totalorder %s110_s23, 0 }
   0xb   : > { %p1472_p8 = por %p132_p5, %p131_p3  ;;  %p172_p9 = scmp.lt.s32.totalorder %s1392_s17, 3 }
   0xc   : > { %s1478_s25 = scalar_select %p113_p7, %s1380_s14, %s115_s21  }
   0xd   : > { %p173_p10 = pnand %p1204_p6, %p172_p9 }
   0xe   : > { %p204_p11 = scmp.lt.s32.totalorder (!%p173_p10), %s1384_s15, 1  ;;  %s1395_s4 = smov (!%p173_p10), 127  }
   0xf   : > { %176 = sbr.rel (%p173_p10) target bundleno = 400 (0x190), region = 32  ;;  %s1396_s7 = smov (!%p173_p10), 126  }
  0x10   : > { %s1397_s8 = smov (!%p173_p10), 125   ;;  %s1398_s9 = smov (!%p173_p10), 124  }
  0x11   : > { %s1399_s10 = smov (!%p173_p10), 123   ;;  %s1400_s11 = smov (!%p173_p10), 122  }
  0x12   : > { %s1402_s18 = smov (!%p173_p10), 121   ;;  %s1403_s19 = smov (!%p173_p10), 120  }
  0x13   : > { %s201_s23 = sand.u32 (!%p173_p10), 1, %s1376_s13  }
  0x14   : > { %s205_s26 = scalar_select %p204_p11, %s1384_s15, 1  ;;  %v1394_v0 = vmov 0.0   ;;  %vm231_vm0 = vcmask 1043456   ;;  %v223_v5 = vld [vmem:[%s1602_s1] sm:$0xff]  ;;  %vm227_vm1 = vcmask 31744   ;;  %v1401_v11 = vmov 0  }
  0x15   : > { %300 = vmatprep.mubr.f32.mxu0 %v1394_v0  ;;  %396 = vmatprep.mubr.f32.mxu1 %v1394_v0  ;;  %v217_v13 = vld [vmem:[%s1603_s2] sm:$0xff]  ;;  %vm418_vm2 = vcmask 1031168   ;;  %vm322_vm3 = vcmask 1039360   ;;  %v1210_v24 = vld [vmem:[%s1602_s1 + $0x8] sm:$0xff]  ;;  %v1214_v25 = vld [vmem:[%s1602_s1 + $0x10] sm:$0xff]  ;;  %vm514_vm4 = vcmask 1022976  }
  0x16   : > { %s1248_s27 = smul.u32 12, %s205_s26  ;;  %1314 = vset.pattern.permute.xlu0 %v1401_v11  ;;  %v1218_v31 = vld [vmem:[%s1602_s1 + $0x18] sm:$0xff]  ;;  %vm610_vm5 = vcmask 1014784   ;;  %v1222_v37 = vld [vmem:[%s1602_s1 + $0x20] sm:$0xff]  ;;  %vm706_vm6 = vcmask 1006592   ;;  %v1226_v43 = vld [vmem:[%s1602_s1 + $0x28] sm:$0xff] }
  0x17   : > { %vm802_vm7 = vcmask 998400   ;;  %v1230_v49 = vld [vmem:[%s1602_s1 + $0x30] sm:$0xff]  ;;  %vm898_vm8 = vcmask 990208   ;;  %v1234_v55 = vld [vmem:[%s1602_s1 + $0x38] sm:$0xff]  ;;  %vm994_vm9 = vcmask 982016   ;;  %v1238_v61 = vld [vmem:[%s1602_s1 + $0x40] sm:$0xff] }
  0x18   : > { %s1487_s30 = scalar_lea.vmem %s1601_s0, %s1248_s27  ;;  %s1205_s26 = sshll.u32 %s201_s23, 4 }
  0x19   : > { %v312_v1 = vld [vmem:[%s1487_s30 + $0x8] sm:$0xf]  ;;  %v311_v2 = vld [vmem:[%s1487_s30] sm:$0xff]  ;;  %s1247_s27 = sshll.u32 %s1384_s15, 8  ;;  %s203_s28 = scalar_lea.vmem [#allocation2], %s1205_s26 }
  0x1a   : > { %320 = vrot.lane.b32.xlu0 %v312_v1, %s1395_s4  ;;  %316 = vrot.lane.b32.xlu1 %v311_v2, %s1395_s4  ;;  %v315_v3 = vcombine.high %v311_v2, %v311_v2  ;;  %v408_v4 = vld [vmem:[%s1487_s30 + $0x8] sm:$0xf]  ;;  %s1098_s29 = sshll.u32 %s203_s28, 4  ;;  %s1096_s5 = scalar_lea.hbm %s1604_s3, %s1247_s27  ;;  %s1099_s29 = int_to_ptr.vmem [resolvable:$true] %s1098_s29 }
  0x1b   : > { %v504_v6 = vld [vmem:[%s1487_s30 + $0x8] sm:$0xf]  ;;  %s1082_s6 = scalar_lea.sflag [#allocation3], %s201_s23 }
  0x1c   : > { %1207 = vmatprep.subr.msk.mxu0 %vm231_vm0, %v315_v3  ;;  %v600_v7 = vld [vmem:[%s1487_s30 + $0x8] sm:$0xf] }
  0x1d   : > { %1208 = vmatpush1.msk.msra.mxu0 %vm231_vm0, %v311_v2  ;;  %v696_v8 = vld [vmem:[%s1487_s30 + $0x8] sm:$0xf] }
  0x1e   : > { %416 = vrot.lane.b32.xlu0 %v408_v4, %s1396_s7  ;;  %412 = vrot.lane.b32.xlu1 %v311_v2, %s1396_s7  ;;  %v792_v9 = vld [vmem:[%s1487_s30 + $0x8] sm:$0xf] }
  0x1f   : > { %1209 = vmatmul.mubr.msk.f32.vlgmr.msra.gmra.mxu0 %vm227_vm1, %v223_v5  ;;  %v888_v10 = vld [vmem:[%s1487_s30 + $0x8] sm:$0xf] }
  0x20   : > { %492 = vmatprep.mubr.f32.mxu0 %v1394_v0  ;;  %v984_v12 = vld [vmem:[%s1487_s30 + $0x8] sm:$0xf] }
  0x22   : > { %414 = vrot.lane.b32.xlu1 %v315_v3, %s1396_s7  ;;  %318 = vrot.lane.b32.xlu0 %v315_v3, %s1395_s4  ;;  %s1316_s7 = scalar_lea.vmem %s1099_s29, 256 }
  0x23   : > { %p1317_p12 = scmp.ne.s32.totalorder %s1099_s29, %s1316_s7 }
  0x25   : > { %p1318_p13 = pnand %p1317_p12, %p1465_p4 }
  0x26   : > { %512 = vrot.lane.b32.xlu1 %v504_v6, %s1397_s8  ;;  %510 = vrot.lane.b32.xlu0 %v315_v3, %s1397_s8 }
  0x27   : > { %p1319_p0 = pneg %p1318_p13 }
  0x2a   : > { %606 = vrot.lane.b32.xlu1 %v315_v3, %s1398_s9  ;;  %508 = vrot.lane.b32.xlu0 %v311_v2, %s1397_s8  ;;  %s1404_s8 = smov [#allocation2]  }
  0x2b   : > { %s1320_s15 = sshll.u32 %s1404_s8, 4  ;;  %s1321_s15 = int_to_ptr.vmem [resolvable:$false] %s1320_s15 }
  0x2c   : > { %p1323_p1 = scmp.lt.s32.totalorder %s1099_s29, %s1321_s15 }
  0x2e   : > { %604 = vrot.lane.b32.xlu1 %v311_v2, %s1398_s9  ;;  %608 = vrot.lane.b32.xlu0 %v600_v7, %s1398_s9  ;;  %s1322_s9 = scalar_lea.vmem %s1321_s15, 512 }
  0x2f   : > { %p1324_p2 = scmp.lt.s32.totalorder %s1322_s9, %s1316_s7 }
  0x31   : > { %p1325_p3 = por %p1324_p2, %p1323_p1 }
  0x32   : > { %704 = vrot.lane.b32.xlu1 %v696_v8, %s1399_s10  ;;  %702 = vrot.lane.b32.xlu0 %v315_v3, %s1399_s10 }
  0x33   : > { %p1326_p5 = pnand %p1325_p3, %p1319_p0 }
  0x36   : > { %798 = vrot.lane.b32.xlu1 %v315_v3, %s1400_s11  ;;  %700 = vrot.lane.b32.xlu0 %v311_v2, %s1399_s10 }
  0x3a   : > { %796 = vrot.lane.b32.xlu1 %v311_v2, %s1400_s11  ;;  %800 = vrot.lane.b32.xlu0 %v792_v9, %s1400_s11 }
  0x3e   : > { %896 = vrot.lane.b32.xlu1 %v888_v10, %s1402_s18  ;;  %894 = vrot.lane.b32.xlu0 %v315_v3, %s1402_s18 }
  0x42   : > { %990 = vrot.lane.b32.xlu1 %v315_v3, %s1403_s19  ;;  %892 = vrot.lane.b32.xlu0 %v311_v2, %s1402_s18 }
  0x46   : > { %988 = vrot.lane.b32.xlu1 %v311_v2, %s1403_s19  ;;  %992 = vrot.lane.b32.xlu0 %v984_v12, %s1403_s19 }
  0x4a   : > { %220 = vperm.xlu0 %1314, %v217_v13  }
  0x8c   : > { %v321_v14 = vpop.permute.xlu0 %320  ;;  %v317_v15 = vpop.permute.xlu1 %316 }
  0x90   : > { %v417_v16 = vpop.permute.xlu0 %416  ;;  %v413_v17 = vpop.permute.xlu1 %412 }
  0x94   : > { %v415_v18 = vpop.permute.xlu1 %414  ;;  %v319_v19 = vpop.permute.xlu0 %318 }
  0x95   : > { %v419_v20 = vsel %vm418_vm2, %v413_v17, %v415_v18  ;;  %v420_v21 = vsel %vm418_vm2, %v415_v18, %v417_v16  ;;  %v324_v22 = vsel %vm322_vm3, %v319_v19, %v321_v14  ;;  %v323_v23 = vsel %vm322_vm3, %v317_v15, %v319_v19 }
  0x96   : > { %1211 = vmatprep.subr.msk.mxu1 %vm231_vm0, %v324_v22  ;;  %1215 = vmatprep.subr.msk.mxu0 %vm231_vm0, %v420_v21 }
  0x97   : > { %1212 = vmatpush1.msk.msra.mxu1 %vm231_vm0, %v323_v23  ;;  %1216 = vmatpush1.msk.msra.mxu0 %vm231_vm0, %v419_v20 }
  0x98   : > { %v513_v26 = vpop.permute.xlu1 %512  ;;  %v511_v27 = vpop.permute.xlu0 %510  ;;  %1213 = vmatmul.mubr.msk.f32.vlgmr.msra.gmra.mxu1 %vm227_vm1, %v1210_v24  ;;  %1217 = vmatmul.mubr.msk.f32.vlgmr.msra.gmra.mxu0 %vm227_vm1, %v1214_v25 }
  0x99   : > { %v516_v28 = vsel %vm514_vm4, %v511_v27, %v513_v26  ;;  %588 = vmatprep.mubr.f32.mxu1 %v1394_v0  ;;  %684 = vmatprep.mubr.f32.mxu0 %v1394_v0 }
  0x9a   : > { %1219 = vmatprep.subr.msk.mxu1 %vm231_vm0, %v516_v28 }
  0x9c   : > { %v607_v29 = vpop.permute.xlu1 %606  ;;  %v509_v30 = vpop.permute.xlu0 %508 }
  0x9d   : > { %v515_v32 = vsel %vm514_vm4, %v509_v30, %v511_v27 }
  0x9e   : > { %1220 = vmatpush1.msk.msra.mxu1 %vm231_vm0, %v515_v32 }
  0x9f   : > { %1221 = vmatmul.mubr.msk.f32.vlgmr.msra.gmra.mxu1 %vm227_vm1, %v1218_v31 }
  0xa0   : > { %v605_v33 = vpop.permute.xlu1 %604  ;;  %v609_v34 = vpop.permute.xlu0 %608  ;;  %780 = vmatprep.mubr.f32.mxu1 %v1394_v0 }
  0xa1   : > { %v611_v35 = vsel %vm610_vm5, %v605_v33, %v607_v29  ;;  %v612_v36 = vsel %vm610_vm5, %v607_v29, %v609_v34 }
  0xa2   : > { %1223 = vmatprep.subr.msk.mxu0 %vm231_vm0, %v612_v36 }
  0xa3   : > { %1224 = vmatpush1.msk.msra.mxu0 %vm231_vm0, %v611_v35 }
  0xa4   : > { %v705_v38 = vpop.permute.xlu1 %704  ;;  %v703_v39 = vpop.permute.xlu0 %702  ;;  %1225 = vmatmul.mubr.msk.f32.vlgmr.msra.gmra.mxu0 %vm227_vm1, %v1222_v37 }
  0xa5   : > { %v708_v40 = vsel %vm706_vm6, %v703_v39, %v705_v38  ;;  %876 = vmatprep.mubr.f32.mxu0 %v1394_v0 }
  0xa6   : > { %1227 = vmatprep.subr.msk.mxu1 %vm231_vm0, %v708_v40 }
  0xa8   : > { %v799_v41 = vpop.permute.xlu1 %798  ;;  %v701_v42 = vpop.permute.xlu0 %700 }
  0xa9   : > { %v707_v44 = vsel %vm706_vm6, %v701_v42, %v703_v39 }
  0xaa   : > { %1228 = vmatpush1.msk.msra.mxu1 %vm231_vm0, %v707_v44 }
  0xab   : > { %1229 = vmatmul.mubr.msk.f32.vlgmr.msra.gmra.mxu1 %vm227_vm1, %v1226_v43 }
  0xac   : > { %v797_v45 = vpop.permute.xlu1 %796  ;;  %v801_v46 = vpop.permute.xlu0 %800  ;;  %972 = vmatprep.mubr.f32.mxu1 %v1394_v0 }
  0xad   : > { %v803_v47 = vsel %vm802_vm7, %v797_v45, %v799_v41  ;;  %v804_v48 = vsel %vm802_vm7, %v799_v41, %v801_v46 }
  0xae   : > { %1231 = vmatprep.subr.msk.mxu0 %vm231_vm0, %v804_v48 }
  0xaf   : > { %1232 = vmatpush1.msk.msra.mxu0 %vm231_vm0, %v803_v47 }
  0xb0   : > { %v897_v50 = vpop.permute.xlu1 %896  ;;  %v895_v51 = vpop.permute.xlu0 %894  ;;  %1233 = vmatmul.mubr.msk.f32.vlgmr.msra.gmra.mxu0 %vm227_vm1, %v1230_v49 }
  0xb1   : > { %v900_v52 = vsel %vm898_vm8, %v895_v51, %v897_v50  ;;  %1068 = vmatprep.mubr.f32.mxu0 %v1394_v0 }
  0xb2   : > { %1235 = vmatprep.subr.msk.mxu1 %vm231_vm0, %v900_v52 }
  0xb4   : > { %v991_v53 = vpop.permute.xlu1 %990  ;;  %v893_v54 = vpop.permute.xlu0 %892 }
  0xb5   : > { %v899_v56 = vsel %vm898_vm8, %v893_v54, %v895_v51 }
  0xb6   : > { %1236 = vmatpush1.msk.msra.mxu1 %vm231_vm0, %v899_v56 }
  0xb7   : > { %1237 = vmatmul.mubr.msk.f32.vlgmr.msra.gmra.mxu1 %vm227_vm1, %v1234_v55 }
  0xb8   : > { %v989_v57 = vpop.permute.xlu1 %988  ;;  %v993_v58 = vpop.permute.xlu0 %992 }
  0xb9   : > { %v995_v59 = vsel %vm994_vm9, %v989_v57, %v991_v53  ;;  %v996_v60 = vsel %vm994_vm9, %v991_v53, %v993_v58 }
  0xba   : > { %1239 = vmatprep.subr.msk.mxu0 %vm231_vm0, %v996_v60 }
  0xbb   : > { %1240 = vmatpush1.msk.msra.mxu0 %vm231_vm0, %v995_v59 }
  0xbc   : > { %1241 = vmatmul.mubr.msk.f32.vlgmr.msra.gmra.mxu0 %vm227_vm1, %v1238_v61 }
  0xc5   : > { %v221_v63 = vpop.permute.xlu0 %220 }
  0xdf   : > { %v302_v62 = vpop.f32.mrf.mxu0 }
  0xe0   : > { %v307_v0 = vadd.f32 %v302_v62, %v221_v63 }
  0xe1   : > { %v304_v2 = vpop.f32.mrf.mxu0 }
  0xe2   : > { %v308_v3 = vadd.f32 %v304_v2, %v221_v63 }
 0x158   : > { %v398_v1 = vpop.f32.mrf.mxu1  ;;  %v494_v6 = vpop.f32.mrf.mxu0 }
 0x159   : > { %v403_v4 = vadd.f32 %v398_v1, %v307_v0 }
 0x15a   : > { %v400_v5 = vpop.f32.mrf.mxu1  ;;  %v496_v9 = vpop.f32.mrf.mxu0 }
 0x15b   : > { %v404_v7 = vadd.f32 %v400_v5, %v308_v3  ;;  %v499_v8 = vadd.f32 %v494_v6, %v403_v4 }
 0x15d   : > { %v500_v11 = vadd.f32 %v496_v9, %v404_v7 }
 0x15f   : > { %v590_v10 = vpop.f32.mrf.mxu1 }
 0x160   : > { %v595_v12 = vadd.f32 %v590_v10, %v499_v8 }
 0x161   : > { %v592_v13 = vpop.f32.mrf.mxu1 }
 0x162   : > { %v596_v15 = vadd.f32 %v592_v13, %v500_v11 }
 0x164   : > { %v686_v14 = vpop.f32.mrf.mxu0 }
 0x165   : > { %v691_v16 = vadd.f32 %v686_v14, %v595_v12 }
 0x166   : > { %v688_v17 = vpop.f32.mrf.mxu0 }
 0x167   : > { %v692_v19 = vadd.f32 %v688_v17, %v596_v15 }
 0x16b   : > { %v782_v18 = vpop.f32.mrf.mxu1 }
 0x16c   : > { %v787_v20 = vadd.f32 %v782_v18, %v691_v16 }
 0x16d   : > { %v784_v21 = vpop.f32.mrf.mxu1 }
 0x16e   : > { %v788_v23 = vadd.f32 %v784_v21, %v692_v19 }
 0x170   : > { %v878_v22 = vpop.f32.mrf.mxu0 }
 0x171   : > { %v883_v24 = vadd.f32 %v878_v22, %v787_v20 }
 0x172   : > { %v880_v25 = vpop.f32.mrf.mxu0 }
 0x173   : > { %v884_v27 = vadd.f32 %v880_v25, %v788_v23 }
 0x177   : > { %v974_v26 = vpop.f32.mrf.mxu1 }
 0x178   : > { %v979_v28 = vadd.f32 %v974_v26, %v883_v24 }
 0x179   : > { %v976_v29 = vpop.f32.mrf.mxu1 }
 0x17a   : > { %v980_v31 = vadd.f32 %v976_v29, %v884_v27 }
 0x17c   : > { %v1070_v30 = vpop.f32.mrf.mxu0 }
 0x17d   : > { %v1075_v32 = vadd.f32 %v1070_v30, %v979_v28 }
 0x17e   : > { %v1072_v33 = vpop.f32.mrf.mxu0 }
 0x17f   : > { %v1077_v34 = vmax.f32 %v1075_v32, 0.0  ;;  %v1076_v35 = vadd.f32 %v1072_v33, %v980_v31 }
 0x181   : > { %1079 = vst [vmem:[%s203_s28] sm:$0xff] %v1077_v34  ;;  %v1078_v36 = vmax.f32 %v1076_v35, 0.0 }
 0x183   : > { %1080 = vst [vmem:[%s203_s28 + $0x8] sm:$0xff] %v1078_v36 }
 0x184   : > { %1329 = shalt.err (!%p1326_p5)
}
 0x185   : > { %s1330_s10 = scalar_lea.hbm %s1096_s5, 256  ;;  %s1334_s19 = scalar_lea.hbm %s1604_s3, 512 }
 0x186   : > { %p1331_p6 = scmp.ne.s32.totalorder %s1096_s5, %s1330_s10  ;;  %p1335_p10 = scmp.lt.s32.totalorder %s1096_s5, %s1604_s3 }
 0x187   : > { %p1336_p11 = scmp.lt.s32.totalorder %s1334_s19, %s1330_s10 }
 0x188   : > { %p1332_p7 = pnand %p1331_p6, %p1465_p4 }
 0x189   : > { %p1337_p12 = por %p1336_p11, %p1335_p10 }
 0x18a   : > { %p1333_p9 = pneg %p1332_p7 }
 0x18c   : > { %p1338_p13 = pnand %p1337_p12, %p1333_p9 }
 0x18e   : > { %1341 = shalt.err (!%p1338_p13)
}
 0x18f   : > { %1249 = dma.vmem_to_hbm [thread:$0]  (%p1465_p4), %s1099_s29, 256, %s1096_s5, %s1082_s6  }
 0x190 PF: > { %p1255_p0 = scmp.ge.s32.totalorder %s1392_s17, 2  ;;  %s1110_s26 = sand.u32 1, %s1372_s12  }
 0x191   : > { %s1111_s27 = scalar_lea.sflag [#allocation3], %s1110_s26 }
 0x192   : > { %p1252_p1 = pnand %p1255_p0, %p1472_p8 }
 0x194   : > { %p1253_p2 = pneg %p1252_p1 }
 0x196   : > { %1367 = dma.done.wait (%p1253_p2), %s1111_s27, 256  }
 0x197   : > { %1369 = vsyncadd (%p1253_p2), %s1111_s27, 4294967040  ;;  %s16_s17 = sadd.s32 1, %s1392_s17   ;;  %s1607_s12 = smov %s1376_s13 }
 0x198   : > { %p13_p3 = scmp.ge.s32.totalorder %s16_s17, 4   ;;  %s1608_s13 = smov %s1380_s14 }
 0x199   : > { %s1609_s14 = smov %s1478_s25  ;;  %s1610_s15 = smov %s1388_s16 }
 0x19a   : > { %s1611_s16 = smov %s1613_s20  ;;  %15 = sbr.rel (!%p13_p3) target bundleno = 4 (0x4), region = 81 }
 0x19f   :  { %1116 = vsyncpa [#allocation3], 1 }
 0x1a0   :  { %1118 = vsyncpa [#allocation3 + $0x1], 1 }

</bundles_post_ra>
